<compile_context>
chip_gen: v5e
topology: v5e:2x2
jax: 0.10.0
libtpu: 0.0.40
codegen_flags: <defaults>
</compile_context>

<pallas_src>
import functools

import jax
import jax.numpy as jnp
from jax.experimental import pallas as pl
from jax.experimental.pallas import tpu as pltpu

_TARGET_BLOCK_BYTES = 2 << 20                          # ~2 MiB per buffer
_WIDTH_CHOICES = (4096, 2048, 1024, 512, 256, 128)     # lane-dense last-dim widths


def _identity_kernel(x_ref, o_ref):
    # Elementwise identity copy of the current (block_rows, width) tile.
    o_ref[...] = x_ref[...]


def _identity_copy_2d(x2d):
    rows, width = x2d.shape
    itemsize = jnp.dtype(x2d.dtype).itemsize
    # Rows per ~2 MiB block, rounded down to a multiple of 8 (sublane tile).
    block_rows = max(_TARGET_BLOCK_BYTES // (width * itemsize), 8)
    block_rows = (block_rows // 8) * 8
    if block_rows >= rows:
        block_rows = rows                               # full extent: always legal
    grid = (pl.cdiv(rows, block_rows),)
    return pl.pallas_call(
        _identity_kernel,
        out_shape=jax.ShapeDtypeStruct(x2d.shape, x2d.dtype),
        grid_spec=pltpu.PrefetchScalarGridSpec(
            num_scalar_prefetch=0,
            grid=grid,
            in_specs=[pl.BlockSpec((block_rows, width), lambda i: (i, 0))],
            out_specs=pl.BlockSpec((block_rows, width), lambda i: (i, 0)),
        ),
        compiler_params=pltpu.CompilerParams(
            dimension_semantics=("parallel",),
        ),
        # Output 0 aliases input 0: no extra HBM buffer for an identity op.
        input_output_aliases={0: 0},
    )(x2d)


@functools.partial(jax.jit, donate_argnums=0)
def _show_impl(x):
    shape = x.shape
    total = x.size
    if total == 0:
        return x
    width = next((w for w in _WIDTH_CHOICES if total % w == 0), None)
    if width is None:
        # TODO(synk): element counts not divisible by 128 fall back to a single
        # full-array block (still exact, just not lane-dense).
        x2d = x.reshape(1, total)
    else:
        x2d = x.reshape(total // width, width)
    return _identity_copy_2d(x2d).reshape(shape)


def show(x: jax.Array) -> jax.Array:
    """Pallas equivalent of Show.forward: print the size, return x unchanged."""
    # Host-side print of the (static) size, mirroring print(x.size()).
    print(tuple(x.shape))
    return _show_impl(x)


if __name__ == "__main__":
    key = jax.random.PRNGKey(0)
    x = jax.random.normal(key, (2, 4, 16, 16), dtype=jnp.float32)
    # Independent reference copy: `show` donates its input (the output aliases
    # the same buffer, mirroring PyTorch returning the same tensor object).
    expected = jax.random.normal(key, (2, 4, 16, 16), dtype=jnp.float32)

    y = show(x)
    y = jax.block_until_ready(y)

    assert y.shape == expected.shape and y.dtype == expected.dtype
    assert bool(jnp.array_equal(y, expected))
    print("KERNEL_OK")
</pallas_src>

<mosaic_0001>
module attributes {stable_mosaic.version = 11 : i64} {
  func.func @_identity_kernel(%arg0: i32, %arg1: memref<1x2048xf32, #tpu.memory_space<vmem>>, %arg2: memref<1x2048xf32, #tpu.memory_space<vmem>>) attributes {dimension_semantics = [#tpu.dimension_semantics<parallel>], iteration_bounds = array<i64: 1>, scalar_prefetch = 0 : i64, scratch_operands = 0 : i64, tpu.core_type = #tpu.core_type<tc>, window_params = [{transform_indices = @transform_0, window_bounds = array<i64: 1, 2048>}, {transform_indices = @transform_1, window_bounds = array<i64: 1, 2048>}]} {
    %c0 = arith.constant 0 : index
    %c0_0 = arith.constant 0 : index
    %0 = vector.load %arg1[%c0, %c0_0] : memref<1x2048xf32, #tpu.memory_space<vmem>>, vector<1x2048xf32>
    %c0_1 = arith.constant 0 : index
    %c0_2 = arith.constant 0 : index
    %1 = vector.load %arg2[%c0_1, %c0_2] : memref<1x2048xf32, #tpu.memory_space<vmem>>, vector<1x2048xf32>
    tpu.vector_store %arg2[%c0_1, %c0_2], %0 {strides = array<i32>} : memref<1x2048xf32, #tpu.memory_space<vmem>>, vector<1x2048xf32>,
    return
  }
  func.func @transform_0(%arg0: i32) -> (i32, i32) {
    %c0_i32 = arith.constant 0 : i32
    %c0_i32_0 = arith.constant 0 : i32
    return %arg0, %c0_i32 : i32, i32
  }
  func.func @transform_1(%arg0: i32) -> (i32, i32) {
    %c0_i32 = arith.constant 0 : i32
    %c0_i32_0 = arith.constant 0 : i32
    return %arg0, %c0_i32 : i32, i32
  }
}

</mosaic_0001>

<bundles_post_ra>
// kernel: _show_impl.1
= control target key start
LH: loop header
LB: loop body
LE: loop exit
PB: predicated region body
PF: predicated region fallthrough
CT: control target
= control target key end

     0   :  { %s38_s0 = inlined_call_operand.vmem [shape: f32[1,2048], index: 0, kind: input, shape index: {}, may-alias: {0,1}]   ;;  %s39_s1 = inlined_call_operand.vmem [shape: f32[1,2048], index: 1, kind: output, shape index: {}, may-alias: {0,1}]  }
   0x1   :  { %v8_v0 = vld [vmem:[%s38_s0] sm:$0xff]  ;;  %v9_v1 = vld [vmem:[%s38_s0 + $0x8] sm:$0xff] }
   0x2   :  { %10 = vst [vmem:[%s39_s1] sm:$0xff] %v8_v0 }
   0x3   :  { %11 = vst [vmem:[%s39_s1 + $0x8] sm:$0xff] %v9_v1 }

</bundles_post_ra>
